<compile_context>
chip_gen: v7x
topology: tpu7x:2x2x1
jax: 0.10.0
libtpu: 0.0.40
codegen_flags: <defaults>
</compile_context>

<pallas_src>
import functools

import jax
import jax.numpy as jnp
from jax.experimental import pallas as pl
from jax.experimental.pallas import tpu as pltpu


def policy_kernel(x_ref, w1_ref, b1_ref, wh_ref, bh_ref, mult_ref, off_ref,
                  out_ref, *, n_actions):
    x = x_ref[...]                                                  # (TB, D_in_pad)

    # base: Linear + ReLU (MXU matmul, f32 accumulation)
    h = jnp.dot(x, w1_ref[...], preferred_element_type=jnp.float32) + b1_ref[...]
    h = jnp.maximum(h, 0.0)                                         # (TB, H)

    # fused heads: one (H, 2A) matmul; columns [0, A) = mu logits, [A, 2A) = var logits
    z = jnp.dot(h, wh_ref[...], preferred_element_type=jnp.float32) + bh_ref[...]

    # mu path: tanh then folded range adjustment (tanh(z)*mult + (mult + low))
    mu_part = jnp.tanh(z) * mult_ref[...] + off_ref[...]
    # var path: numerically stable softplus
    var_part = jnp.maximum(z, 0.0) + jnp.log1p(jnp.exp(-jnp.abs(z)))

    col = jax.lax.broadcasted_iota(jnp.int32, z.shape, 1)
    out_ref[...] = jnp.where(col < n_actions, mu_part, var_part)    # (TB, 2A)


def simple_continuous_policy_forward(x, params, *, block_batch=512):
    """x: (B, D_in) f32. params: dict from init_params. Returns (mu, var)."""
    B, D_in = x.shape
    w1 = params["w1_packed"]              # (D_in_pad, H)
    wh = params["wh"]                     # (H, 2A)
    D_in_pad, H = w1.shape
    two_a = wh.shape[1]
    A = two_a // 2

    # Pad feature dim to the packed weight width (multiple of 8 sublanes).
    if D_in_pad != D_in:
        x = jnp.pad(x, ((0, 0), (0, D_in_pad - D_in)))

    # Batch tile: multiple of 8 sublanes, capped at block_batch, batch padded to it.
    tb = min(block_batch, ((B + 7) // 8) * 8)
    tb = max(8, (tb // 8) * 8)
    n_tiles = pl.cdiv(B, tb)
    B_pad = n_tiles * tb
    if B_pad != B:
        x = jnp.pad(x, ((0, B_pad - B), (0, 0)))

    resident = lambda shape: pl.BlockSpec(shape, lambda i: (0, 0))
    in_specs = [
        pl.BlockSpec((tb, D_in_pad), lambda i: (i, 0)),   # x tile (pipelined)
        resident((D_in_pad, H)),                          # w1
        resident((1, H)),                                 # b1
        resident((H, two_a)),                             # packed head weights
        resident((1, two_a)),                             # packed head bias
        resident((1, two_a)),                             # mult (var cols = 1)
        resident((1, two_a)),                             # offset (var cols = 0)
    ]
    out_spec = pl.BlockSpec((tb, two_a), lambda i: (i, 0))

    flops = 2 * B_pad * (D_in_pad * H + H * two_a)
    bytes_accessed = 4 * (B_pad * D_in_pad + B_pad * two_a
                          + D_in_pad * H + H + H * two_a + 4 * two_a)
    cost = pl.CostEstimate(flops=flops,
                           transcendentals=2 * B_pad * two_a,
                           bytes_accessed=bytes_accessed)

    packed_out = pl.pallas_call(
        functools.partial(policy_kernel, n_actions=A),
        out_shape=jax.ShapeDtypeStruct((B_pad, two_a), jnp.float32),
        grid=(n_tiles,),
        in_specs=in_specs,
        out_specs=out_spec,
        compiler_params=pltpu.CompilerParams(
            dimension_semantics=("parallel",)),
        cost_estimate=cost,
    )(x, w1, params["b1"], wh, params["bh"], params["mult2"], params["off2"])

    head = packed_out[:B]
    return head[:, :A], head[:, A:]


def init_params(key, input_dim, hidden, n_actions, action_low, action_high):
    """Deterministic synthetic parameters (uniform fan-in init like nn.Linear)."""
    ks = jax.random.split(key, 6)

    def linear(kw, kb, fan_in, fan_out):
        bound = 1.0 / jnp.sqrt(fan_in)
        w = jax.random.uniform(kw, (fan_in, fan_out), jnp.float32, -bound, bound)
        b = jax.random.uniform(kb, (1, fan_out), jnp.float32, -bound, bound)
        return w, b

    w1, b1 = linear(ks[0], ks[1], input_dim, hidden)
    wmu, bmu = linear(ks[2], ks[3], hidden, n_actions)
    wvar, bvar = linear(ks[4], ks[5], hidden, n_actions)

    low = jnp.asarray(action_low, jnp.float32).reshape(1, n_actions)
    high = jnp.asarray(action_high, jnp.float32).reshape(1, n_actions)
    mult = (high - low) / 2.0                 # action_mult_factor
    offset = mult + low                       # folded (+1)*mult + low

    # Kernel-side packing.
    d_pad = (-input_dim) % 8
    w1_packed = jnp.pad(w1, ((0, d_pad), (0, 0)))                  # (D_in_pad, H)
    wh = jnp.concatenate([wmu, wvar], axis=1)                      # (H, 2A)
    bh = jnp.concatenate([bmu, bvar], axis=1)                      # (1, 2A)
    mult2 = jnp.concatenate([mult, jnp.ones_like(mult)], axis=1)   # (1, 2A)
    off2 = jnp.concatenate([offset, jnp.zeros_like(offset)], axis=1)

    return dict(
        # raw (for reference check)
        w1=w1, b1=b1, wmu=wmu, bmu=bmu, wvar=wvar, bvar=bvar, mult=mult, low=low,
        # packed (for kernel)
        w1_packed=w1_packed, wh=wh, bh=bh, mult2=mult2, off2=off2,
    )


def reference_forward(x, p):
    h = jnp.maximum(x @ p["w1"] + p["b1"], 0.0)
    mu = jnp.tanh(h @ p["wmu"] + p["bmu"])
    mu = (mu + 1.0) * p["mult"] + p["low"]
    var = jax.nn.softplus(h @ p["wvar"] + p["bvar"])
    return mu, var


if __name__ == "__main__":
    key = jax.random.PRNGKey(0)
    B, D_IN, HIDDEN, N_ACT = 8, 4, 128, 2
    action_low = [-2.0, -1.0]
    action_high = [2.0, 1.0]

    kx, kp = jax.random.split(key)
    x = jax.random.normal(kx, (B, D_IN), jnp.float32)
    params = init_params(kp, D_IN, HIDDEN, N_ACT, action_low, action_high)

    mu, var = simple_continuous_policy_forward(x, params)
    jax.block_until_ready((mu, var))

    mu_ref, var_ref = reference_forward(x, params)
    assert mu.shape == (B, N_ACT) and var.shape == (B, N_ACT)
    assert jnp.allclose(mu, mu_ref, atol=1e-5, rtol=1e-5)
    assert jnp.allclose(var, var_ref, atol=1e-5, rtol=1e-5)

    print("KERNEL_OK")
</pallas_src>

<mosaic_0001>
module attributes {stable_mosaic.version = 11 : i64} {
  func.func @policy_kernel(%arg0: i32, %arg1: memref<8x8xf32, #tpu.memory_space<vmem>>, %arg2: memref<8x128xf32, #tpu.memory_space<vmem>>, %arg3: memref<1x128xf32, #tpu.memory_space<vmem>>, %arg4: memref<128x4xf32, #tpu.memory_space<vmem>>, %arg5: memref<1x4xf32, #tpu.memory_space<vmem>>, %arg6: memref<1x4xf32, #tpu.memory_space<vmem>>, %arg7: memref<1x4xf32, #tpu.memory_space<vmem>>, %arg8: memref<8x4xf32, #tpu.memory_space<vmem>>) attributes {dimension_semantics = [#tpu.dimension_semantics<parallel>], iteration_bounds = array<i64: 1>, scalar_prefetch = 0 : i64, scratch_operands = 0 : i64, tpu.core_type = #tpu.core_type<tc>, window_params = [{transform_indices = @transform_0, window_bounds = array<i64: 8, 8>}, {pipeline_mode = #tpu.pipeline_mode<synchronous>, transform_indices = @transform_1, window_bounds = array<i64: 8, 128>}, {pipeline_mode = #tpu.pipeline_mode<synchronous>, transform_indices = @transform_2, window_bounds = array<i64: 1, 128>}, {pipeline_mode = #tpu.pipeline_mode<synchronous>, transform_indices = @transform_3, window_bounds = array<i64: 128, 4>}, {pipeline_mode = #tpu.pipeline_mode<synchronous>, transform_indices = @transform_4, window_bounds = array<i64: 1, 4>}, {pipeline_mode = #tpu.pipeline_mode<synchronous>, transform_indices = @transform_5, window_bounds = array<i64: 1, 4>}, {pipeline_mode = #tpu.pipeline_mode<synchronous>, transform_indices = @transform_6, window_bounds = array<i64: 1, 4>}, {transform_indices = @transform_7, window_bounds = array<i64: 8, 4>}]} {
    %c0 = arith.constant 0 : index
    %c0_0 = arith.constant 0 : index
    %0 = vector.load %arg1[%c0, %c0_0] : memref<8x8xf32, #tpu.memory_space<vmem>>, vector<8x8xf32>
    %c0_1 = arith.constant 0 : index
    %c0_2 = arith.constant 0 : index
    %1 = vector.load %arg2[%c0_1, %c0_2] : memref<8x128xf32, #tpu.memory_space<vmem>>, vector<8x128xf32>
    %cst = arith.constant dense<0.000000e+00> : vector<8x128xf32>
    %2 = tpu.matmul %0, %1, %cst {dimension_numbers = #tpu.dot_dimension_numbers<[1], [0], [0], [1], [0, 0, 1, 1], [], []>} : vector<8x8xf32>, vector<8x128xf32>, vector<8x128xf32> -> vector<8x128xf32>
    %c0_3 = arith.constant 0 : index
    %c0_4 = arith.constant 0 : index
    %3 = vector.load %arg3[%c0_3, %c0_4] : memref<1x128xf32, #tpu.memory_space<vmem>>, vector<1x128xf32>
    %4 = vector.broadcast %3 : vector<1x128xf32> to vector<8x128xf32>
    %5 = arith.addf %2, %4 : vector<8x128xf32>
    %cst_5 = arith.constant 0.000000e+00 : f32
    %6 = vector.broadcast %cst_5 : f32 to vector<8x128xf32>
    %7 = arith.maximumf %5, %6 : vector<8x128xf32>
    %c0_6 = arith.constant 0 : index
    %c0_7 = arith.constant 0 : index
    %8 = vector.load %arg4[%c0_6, %c0_7] : memref<128x4xf32, #tpu.memory_space<vmem>>, vector<128x4xf32>
    %cst_8 = arith.constant dense<0.000000e+00> : vector<8x4xf32>
    %9 = tpu.matmul %7, %8, %cst_8 {dimension_numbers = #tpu.dot_dimension_numbers<[1], [0], [0], [1], [0, 0, 1, 1], [], []>} : vector<8x128xf32>, vector<128x4xf32>, vector<8x4xf32> -> vector<8x4xf32>
    %c0_9 = arith.constant 0 : index
    %c0_10 = arith.constant 0 : index
    %10 = vector.load %arg5[%c0_9, %c0_10] : memref<1x4xf32, #tpu.memory_space<vmem>>, vector<1x4xf32>
    %11 = vector.broadcast %10 : vector<1x4xf32> to vector<8x4xf32>
    %12 = arith.addf %9, %11 : vector<8x4xf32>
    %13 = math.tanh %12 : vector<8x4xf32>
    %c0_11 = arith.constant 0 : index
    %c0_12 = arith.constant 0 : index
    %14 = vector.load %arg6[%c0_11, %c0_12] : memref<1x4xf32, #tpu.memory_space<vmem>>, vector<1x4xf32>
    %15 = vector.broadcast %14 : vector<1x4xf32> to vector<8x4xf32>
    %16 = arith.mulf %13, %15 : vector<8x4xf32>
    %c0_13 = arith.constant 0 : index
    %c0_14 = arith.constant 0 : index
    %17 = vector.load %arg7[%c0_13, %c0_14] : memref<1x4xf32, #tpu.memory_space<vmem>>, vector<1x4xf32>
    %18 = vector.broadcast %17 : vector<1x4xf32> to vector<8x4xf32>
    %19 = arith.addf %16, %18 : vector<8x4xf32>
    %cst_15 = arith.constant 0.000000e+00 : f32
    %20 = vector.broadcast %cst_15 : f32 to vector<8x4xf32>
    %21 = arith.maximumf %12, %20 : vector<8x4xf32>
    %22 = math.absf %12 : vector<8x4xf32>
    %cst_16 = arith.constant 0.000000e+00 : f32
    %23 = vector.broadcast %cst_16 : f32 to vector<8x4xf32>
    %24 = arith.subf %23, %22 : vector<8x4xf32>
    %25 = math.exp %24 : vector<8x4xf32>
    %26 = math.log1p %25 : vector<8x4xf32>
    %27 = arith.addf %21, %26 : vector<8x4xf32>
    %28 = tpu.iota {dimensions = array<i32: 1>} : vector<8x4xi32>
    %c2_i32 = arith.constant 2 : i32
    %29 = vector.broadcast %c2_i32 : i32 to vector<8x4xi32>
    %30 = arith.cmpi slt, %28, %29 : vector<8x4xi32>
    %31 = arith.select %30, %19, %27 : vector<8x4xi1>, vector<8x4xf32>
    %c0_17 = arith.constant 0 : index
    %c0_18 = arith.constant 0 : index
    %32 = vector.load %arg8[%c0_17, %c0_18] : memref<8x4xf32, #tpu.memory_space<vmem>>, vector<8x4xf32>
    tpu.vector_store %arg8[%c0_17, %c0_18], %31 {strides = array<i32>} : memref<8x4xf32, #tpu.memory_space<vmem>>, vector<8x4xf32>,
    return
  }
  func.func @transform_0(%arg0: i32) -> (i32, i32) {
    %c0_i32 = arith.constant 0 : i32
    %c0_i32_0 = arith.constant 0 : i32
    return %arg0, %c0_i32 : i32, i32
  }
  func.func @transform_1(%arg0: i32) -> (i32, i32) {
    %c0_i32 = arith.constant 0 : i32
    %c0_i32_0 = arith.constant 0 : i32
    %c0_i32_1 = arith.constant 0 : i32
    return %c0_i32, %c0_i32_0 : i32, i32
  }
  func.func @transform_2(%arg0: i32) -> (i32, i32) {
    %c0_i32 = arith.constant 0 : i32
    %c0_i32_0 = arith.constant 0 : i32
    %c0_i32_1 = arith.constant 0 : i32
    return %c0_i32, %c0_i32_0 : i32, i32
  }
  func.func @transform_3(%arg0: i32) -> (i32, i32) {
    %c0_i32 = arith.constant 0 : i32
    %c0_i32_0 = arith.constant 0 : i32
    %c0_i32_1 = arith.constant 0 : i32
    return %c0_i32, %c0_i32_0 : i32, i32
  }
  func.func @transform_4(%arg0: i32) -> (i32, i32) {
    %c0_i32 = arith.constant 0 : i32
    %c0_i32_0 = arith.constant 0 : i32
    %c0_i32_1 = arith.constant 0 : i32
    return %c0_i32, %c0_i32_0 : i32, i32
  }
  func.func @transform_5(%arg0: i32) -> (i32, i32) {
    %c0_i32 = arith.constant 0 : i32
    %c0_i32_0 = arith.constant 0 : i32
    %c0_i32_1 = arith.constant 0 : i32
    return %c0_i32, %c0_i32_0 : i32, i32
  }
  func.func @transform_6(%arg0: i32) -> (i32, i32) {
    %c0_i32 = arith.constant 0 : i32
    %c0_i32_0 = arith.constant 0 : i32
    %c0_i32_1 = arith.constant 0 : i32
    return %c0_i32, %c0_i32_0 : i32, i32
  }
  func.func @transform_7(%arg0: i32) -> (i32, i32) {
    %c0_i32 = arith.constant 0 : i32
    %c0_i32_0 = arith.constant 0 : i32
    return %arg0, %c0_i32 : i32, i32
  }
}

</mosaic_0001>

<bundles_post_ra>
// kernel: tpu_custom_call.1
= control target key start
LH: loop header
LB: loop body
LE: loop exit
PB: predicated region body
PF: predicated region fallthrough
CT: control target
= control target key end

     0   :  { %vm35_vm0 = vcmask 64512   ;;  %v342_v0 = vmov 0.0   ;;  %vm343_vm1 = vmmov 0   ;;  %v344_v4 = vmov 0.0|0.0   ;;  %s454_s1 = inlined_call_operand.vmem [shape: f32[8,128], index: 1, kind: input, shape index: {}]   ;;  %s455_s0 = inlined_call_operand.vmem [shape: f32[8,8], index: 0, kind: input, shape index: {}]   ;;  %s456_s3 = inlined_call_operand.vmem [shape: f32[128,4], index: 3, kind: input, shape index: {}]   ;;  %s457_s2 = inlined_call_operand.vmem [shape: f32[1,128], index: 2, kind: input, shape index: {}]   ;;  %s458_s4 = inlined_call_operand.vmem [shape: f32[1,4], index: 4, kind: input, shape index: {}]   ;;  %s459_s5 = inlined_call_operand.vmem [shape: f32[1,4], index: 5, kind: input, shape index: {}]   ;;  %s460_s6 = inlined_call_operand.vmem [shape: f32[1,4], index: 6, kind: input, shape index: {}]   ;;  %s461_s7 = inlined_call_operand.vmem [shape: f32[8,4], index: 7, kind: output, shape index: {}]  }
   0x1   :  { %269 = vmatprep.subr.mxu0 %v342_v0  ;;  %v27_v1 = vld [vmem:[%s454_s1] sm:$0xff]  ;;  %271 = vmatprep.mubr.msk.f32.mxu0 %vm343_vm1, %v342_v0  ;;  %v111_v5 = vld [vmem:[%s456_s3 + $0x8] sm:$0xff]  ;;  %v112_v6 = vld [vmem:[%s456_s3 + $0x10] sm:$0xff]  ;;  %v235_v43 = vlaneseq  ;;  %vm239_vm4 = vcmask 31744  }
   0x2   :  { %v26_v2 = vld [vmem:[%s455_s0] sm:$0xff]  ;;  %270 = vmatpush3.msra.mxu0 %v27_v1  ;;  %309 = vmatprep.subr.bf16.mxu1 %v344_v4  ;;  %v113_v7 = vld [vmem:[%s456_s3 + $0x18] sm:$0xff]  ;;  %v115_v11 = vld [vmem:[%s456_s3 + $0x28] sm:$0xff] }
   0x3   :  { %v110_v3 = vld [vmem:[%s456_s3] sm:$0xff]  ;;  %272 = vmatmul.mubr.msk.f32.vlgmr.msra.gmra.mrb[0].mxu0 %vm35_vm0, %v26_v2  ;;  %306 = vmatprep.mubr.msk.f32.mxu1 %vm343_vm1, %v342_v0  ;;  %v313_v9 = vpack.c.bf16 %v113_v7, %v112_v6  ;;  %v116_v13 = vld [vmem:[%s456_s3 + $0x30] sm:$0xff]  ;;  %v117_v14 = vld [vmem:[%s456_s3 + $0x38] sm:$0xff]  ;;  %v236_v48 = vand.u32 127, %v235_v43 }
   0x4   :  { %v310_v8 = vpack.c.bf16 %v111_v5, %v110_v3  ;;  %v114_v10 = vld [vmem:[%s456_s3 + $0x20] sm:$0xff]  ;;  %v319_v15 = vpack.c.bf16 %v117_v14, %v116_v13  ;;  %v119_v17 = vld [vmem:[%s456_s3 + $0x48] sm:$0xff]  ;;  %v120_v19 = vld [vmem:[%s456_s3 + $0x50] sm:$0xff] }
   0x5   :  { %v316_v12 = vpack.c.bf16 %v115_v11, %v114_v10  ;;  %v118_v16 = vld [vmem:[%s456_s3 + $0x40] sm:$0xff]  ;;  %v121_v20 = vld [vmem:[%s456_s3 + $0x58] sm:$0xff]  ;;  %v123_v23 = vld [vmem:[%s456_s3 + $0x68] sm:$0xff]  ;;  %vm237_vm3 = vcmp.lt.s32.totalorder %v236_v48, 2 }
   0x6   :  { %311 = vmatpush3.bf16.msra.mxu1 %v310_v8  ;;  %v322_v18 = vpack.c.bf16 %v119_v17, %v118_v16  ;;  %v325_v21 = vpack.c.bf16 %v121_v20, %v120_v19  ;;  %v122_v22 = vld [vmem:[%s456_s3 + $0x60] sm:$0xff]  ;;  %v124_v25 = vld [vmem:[%s456_s3 + $0x70] sm:$0xff]  ;;  %v125_v26 = vld [vmem:[%s456_s3 + $0x78] sm:$0xff] }
   0x7   :  { %312 = vmatprep.subr.bf16.mxu1 %v344_v4  ;;  %v328_v24 = vpack.c.bf16 %v123_v23, %v122_v22  ;;  %v331_v27 = vpack.c.bf16 %v125_v26, %v124_v25  ;;  %v245_v28 = vld [vmem:[%s457_s2] ss:$0 sm:$0xff] }
   0x8   :  { %v247_v33 = vld [vmem:[%s458_s4] ss:$0 sm:$0xff] }
   0x9   :  { %v248_v45 = vld [vmem:[%s459_s5] ss:$0 sm:$0xff] }
   0xa   :  { %314 = vmatpush3.bf16.msra.mxu1 %v313_v9  ;;  %v249_v51 = vld [vmem:[%s460_s6] ss:$0 sm:$0xff] }
   0xb   :  { %315 = vmatprep.subr.bf16.mxu1 %v344_v4 }
   0xe   :  { %317 = vmatpush3.bf16.msra.mxu1 %v316_v12 }
   0xf   :  { %318 = vmatprep.subr.bf16.mxu1 %v344_v4 }
  0x12   :  { %320 = vmatpush3.bf16.msra.mxu1 %v319_v15 }
  0x13   :  { %321 = vmatprep.subr.bf16.mxu1 %v344_v4 }
  0x16   :  { %323 = vmatpush3.bf16.msra.mxu1 %v322_v18 }
  0x17   :  { %324 = vmatprep.subr.bf16.mxu1 %v344_v4 }
  0x1a   :  { %326 = vmatpush3.bf16.msra.mxu1 %v325_v21 }
  0x1b   :  { %327 = vmatprep.subr.bf16.mxu1 %v344_v4 }
  0x1e   :  { %329 = vmatpush3.bf16.msra.mxu1 %v328_v24 }
  0x1f   :  { %330 = vmatprep.subr.bf16.mxu1 %v344_v4 }
  0x22   :  { %332 = vmatpush3.bf16.msra.mxu1 %v331_v27 }
  0xd6   :  { %v105_v29 = vpop.f32.mrb[0].mxu0 }
  0xd7   :  { %v106_v30 = vadd.f32 %v245_v28, %v105_v29  ;;  %v273_v31 = vpop.f32.mrb[1].mxu0 }
  0xd9   :  { %v109_v32 = vmax.f32 %v106_v30, 0.0 }
  0xdb   :  { %307 = vmatmul.mubr.f32.vlgmr.msra.gmra.mrb[0].mxu1 %v109_v32 }
 0x1ae   :  { %v199_v34 = vpop.f32.mrb[0].mxu1 }
 0x1af   :  { %v200_v35 = vadd.f32 %v247_v33, %v199_v34  ;;  %v308_v36 = vpop.f32.mrb[1].mxu1 }
 0x1b1   :  { %v221_v37 = vand.u32 2147483647, %v200_v35  ;;  %v220_v54 = vmax.f32 %v200_v35, 0.0 }
 0x1b3   :  { %v222_v38 = vsub.f32 0.0, %v221_v37 }
 0x1b5   :  { %v223_v39 = vmul.f32 1.442695, %v222_v38 }
 0x1b7   :  { %336 = vpow2.f32 %v223_v39 }
 0x1b8   :  { %338 = vtanh.f32 %v200_v35 }
 0x1c1   :  { %v337_v40 = vpop.eup %336 }
 0x1c2   :  { %v225_v41 = vadd.f32 1.0, %v337_v40  ;;  %v228_v42 = vmul.f32 -0.5, %v337_v40  ;;  %v339_v44 = vpop.eup %338  ;;  %v231_v47 = vand.u32 2147483647, %v337_v40 }
 0x1c3   :  { %v211_v50 = vmul.f32 %v339_v44, %v248_v45 }
 0x1c4   :  { %340 = vlog2.f32 %v225_v41  ;;  %v229_v46 = vadd.f32 1.0, %v228_v42  ;;  %vm232_vm2 = vcmp.lt.f32.partialorder %v231_v47, 0.0004427343 }
 0x1c5   :  { %v219_v56 = vadd.f32 %v249_v51, %v211_v50 }
 0x1c6   :  { %v230_v53 = vmul.f32 %v337_v40, %v229_v46 }
 0x1ce   :  { %v341_v49 = vpop.eup %340 }
 0x1cf   :  { %v227_v52 = vmul.f32 0.6931472, %v341_v49 }
 0x1d1   :  { %v233_v55 = vsel %vm232_vm2, %v230_v53, %v227_v52 }
 0x1d2   :  { %v234_v57 = vadd.f32 %v233_v55, %v220_v54 }
 0x1d4   :  { %v238_v58 = vsel %vm237_vm3, %v219_v56, %v234_v57 }
 0x1d5   :  { %240 = vst.msk [vmem:[%s461_s7] sm:$0xff] %vm239_vm4, %v238_v58 }

</bundles_post_ra>
